<compile_context>
chip_gen: v7x
topology: tpu7x:2x2x1
jax: 0.10.0
libtpu: 0.0.40
codegen_flags: <defaults>
</compile_context>

<pallas_src>
import functools

import jax
import jax.numpy as jnp
from jax import lax
from jax.experimental import pallas as pl
from jax.experimental.pallas import tpu as pltpu

EPS = 0.0001
# Guard against degenerate tiny-C cases blowing up in-kernel f32 temps; for the
# reviewed C=4 bf16 case this no longer binds (524288 lanes = 4 MiB block).
_MAX_TILE_P = 512 * 1024


def _tpu_budgets():
    """Return (target logits-block HBM bytes, scoped VMEM limit bytes)."""
    try:
        vmem = int(getattr(pltpu.get_tpu_info(), "vmem_capacity_bytes", 0))
    except Exception:
        vmem = 0
    if vmem >= 100 * 1024 * 1024:          # v5e / v6e: 128 MiB physical VMEM
        return 4 * 1024 * 1024, 64 * 1024 * 1024
    # v7x (64 MiB per TensorCore) or unknown backend: stay conservative.
    return 2 * 1024 * 1024, 40 * 1024 * 1024


def _choose_tile_p(n_pix, n_cls, itemsize, target_bytes):
    """Pixels per block: multiple of 128 (or the full pixel count if <= 128),
    sized so one logits block is roughly `target_bytes` in HBM."""
    if n_pix <= 128:
        return n_pix                            # full dim -> always legal
    tp = target_bytes // max(1, n_cls * itemsize)
    tp = min(tp, _MAX_TILE_P)
    tp = max(128, (tp // 128) * 128)
    tp = min(tp, (n_pix // 128) * 128)          # keep block dim <= array dim
    return max(tp, 128)


def _combo_kernel(x_ref, lbl_ref, ce_ref, num_ref, cnt_ref, *,
                  n_pix, tile_p, needs_mask):
    # x_ref:   (1, C, TILE_P) logits (classes on sublanes, pixels on lanes)
    # lbl_ref: (1, 1, TILE_P) raw labels (0 == ignore after the -1 shift)
    # ce_ref / num_ref / cnt_ref: (1, 1, 1, 128) per-(b,p) partial slots
    x = x_ref[0].astype(jnp.float32)            # (C, T) upcast in-kernel
    lbl = lbl_ref[0].astype(jnp.int32)          # (1, T)

    tgt = lbl - 1                               # labels - 1 (ComboLoss.forward)
    valid = tgt != -1                           # (1, T) bool

    if needs_mask:
        # Only emitted when P % TILE_P != 0: mask the ragged final tile so
        # garbage padded lanes cannot produce Inf/NaN through exp().
        p = pl.program_id(1)
        lane_idx = lax.broadcasted_iota(jnp.int32, lbl.shape, 1) + p * tile_p
        in_bounds = lane_idx < n_pix            # (1, T)
        valid = jnp.logical_and(valid, in_bounds)
        x = jnp.where(in_bounds, x, 0.0)

    validf = valid.astype(jnp.float32)          # (1, T)
    tgt_c = jnp.where(valid, tgt, 0)            # clamp ignored rows to class 0

    # Numerically stable log-sum-exp over the class (sublane) axis.
    m = jnp.max(x, axis=0, keepdims=True)       # (1, T)
    z = x - m                                   # (C, T)
    ez = jnp.exp(z)                             # (C, T)  (reused below)
    sez = jnp.sum(ez, axis=0, keepdims=True)    # (1, T)
    inv = pl.reciprocal(sez, approx=False)      # exact 1/sum(exp)
    log_sez = jnp.log(sez)                      # (1, T)

    # Target-class picks via boolean select (no float one-hot, no second exp).
    cls_ids = lax.broadcasted_iota(jnp.int32, x.shape, 0)            # (C, T)
    onehot = cls_ids == tgt_c                                        # (C, T)
    z_tgt = jnp.sum(jnp.where(onehot, z, 0.0), axis=0, keepdims=True)   # (1,T)
    ez_tgt = jnp.sum(jnp.where(onehot, ez, 0.0), axis=0, keepdims=True)  # (1,T)

    ce_pix = (log_sez - z_tgt) * validf         # per-pixel CE, 0 on ignored
    num_pix = ez_tgt * inv * validf             # softmax prob at target class
    # Dice denominator per pixel is (sum_c probs + sum_c onehot) = 2 on valid
    # pixels, so only the valid count is accumulated (den_sum = 2 * count).

    ce_t = jnp.sum(ce_pix, axis=1, keepdims=True)     # (1, 1)
    num_t = jnp.sum(num_pix, axis=1, keepdims=True)   # (1, 1)
    cnt_t = jnp.sum(validf, axis=1, keepdims=True)    # (1, 1)

    ce_ref[...] = jnp.broadcast_to(ce_t.reshape(1, 1, 1, 1), ce_ref.shape)
    num_ref[...] = jnp.broadcast_to(num_t.reshape(1, 1, 1, 1), num_ref.shape)
    cnt_ref[...] = jnp.broadcast_to(cnt_t.reshape(1, 1, 1, 1), cnt_ref.shape)


@functools.partial(jax.jit, static_argnames=("gamma", "loss_wts"))
def combo_loss(output, labels, gamma=2.0, loss_wts=(1.0, 1.0)):
    """output: (B, C, H, W) logits (any float dtype), labels: (B, H, W) ints."""
    B, C, H, W = output.shape
    P = H * W
    n_rows = B * P                              # CE mean divisor (all rows)

    # Free reshapes only — no transpose, no dtype cast of the big tensors.
    x3 = output.reshape(B, C, P)
    if labels.dtype not in (jnp.int32, jnp.int8, jnp.uint8, jnp.int16):
        labels = labels.astype(jnp.int32)       # e.g. int64 -> int32 once
    l3 = labels.reshape(B, 1, P)

    target_bytes, vmem_limit = _tpu_budgets()
    tile_p = _choose_tile_p(P, C, x3.dtype.itemsize, target_bytes)
    n_pt = pl.cdiv(P, tile_p)
    needs_mask = (P % tile_p) != 0

    kernel = functools.partial(_combo_kernel, n_pix=P, tile_p=tile_p,
                               needs_mask=needs_mask)
    part_shape = jax.ShapeDtypeStruct((B, n_pt, 1, 128), jnp.float32)

    ce_p, num_p, cnt_p = pl.pallas_call(
        kernel,
        out_shape=(part_shape, part_shape, part_shape),
        grid_spec=pltpu.PrefetchScalarGridSpec(
            num_scalar_prefetch=0,
            grid=(B, n_pt),
            in_specs=[
                pl.BlockSpec((1, C, tile_p), lambda b, p: (b, 0, p)),
                pl.BlockSpec((1, 1, tile_p), lambda b, p: (b, 0, p)),
            ],
            out_specs=[
                pl.BlockSpec((1, 1, 1, 128), lambda b, p: (b, p, 0, 0)),
                pl.BlockSpec((1, 1, 1, 128), lambda b, p: (b, p, 0, 0)),
                pl.BlockSpec((1, 1, 1, 128), lambda b, p: (b, p, 0, 0)),
            ],
        ),
        compiler_params=pltpu.CompilerParams(
            # Every (b, p) cell writes a unique output slot -> both axes can be
            # sharded across TensorCores (v7x megacore); single-TC chips are
            # unaffected.
            dimension_semantics=("parallel", "parallel"),
            vmem_limit_bytes=vmem_limit,
        ),
    )(x3, l3)

    ce_sum = jnp.sum(ce_p[:, :, 0, 0])
    num_sum = jnp.sum(num_p[:, :, 0, 0])
    den_sum = 2.0 * jnp.sum(cnt_p[:, :, 0, 0])

    # CELoss: reduction='mean' divides by total row count (incl. ignored rows).
    ce_loss = ce_sum / n_rows
    # Focal term is computed in the PyTorch module but NOT returned (parity).
    pt = jnp.exp(-ce_loss)
    _focal_unused = (1.0 - pt) ** gamma * ce_loss

    # DiceLoss with the original operator precedence: (2*num+eps)/den + eps.
    # Note: zero valid pixels -> den_sum == 0 -> inf/nan, exactly like the
    # reference PyTorch module (kept for parity).
    dice_loss = 1.0 - ((2.0 * num_sum + EPS) / den_sum + EPS)

    return loss_wts[0] * ce_loss + loss_wts[1] * dice_loss


def _reference_combo_loss(output, labels):
    """Pure-JAX reference mirroring the PyTorch forward (incl. its transpose)."""
    B, C, H, W = output.shape
    x = jnp.transpose(output, (0, 3, 2, 1)).reshape(-1, C).astype(jnp.float32)
    t = jnp.transpose(labels, (0, 2, 1)).reshape(-1).astype(jnp.int32) - 1
    valid = t != -1
    t_c = jnp.where(valid, t, 0)
    logp = jax.nn.log_softmax(x, axis=-1)
    probs = jax.nn.softmax(x, axis=-1)
    onehot_raw = jax.nn.one_hot(t_c, C, dtype=jnp.float32)
    onehot = onehot_raw * valid[:, None]
    ce_rows = -jnp.sum(logp * onehot_raw, axis=-1) * valid
    ce = jnp.mean(ce_rows)
    num = jnp.sum(probs * onehot)
    den = jnp.sum((probs + onehot) * valid[:, None])
    dice = 1.0 - ((2.0 * num + EPS) / den + EPS)
    return ce + dice


if __name__ == "__main__":
    key = jax.random.PRNGKey(0)
    k1, k2 = jax.random.split(key)
    B, C, H, W = 2, 4, 16, 16
    output = jax.random.normal(k1, (B, C, H, W), dtype=jnp.float32)
    # labels in [0, C]; 0 becomes ignore_index (-1) after the -1 shift
    labels = jax.random.randint(k2, (B, H, W), 0, C + 1, dtype=jnp.int32)

    loss = jax.block_until_ready(combo_loss(output, labels))
    ref = jax.block_until_ready(_reference_combo_loss(output, labels))
    assert jnp.allclose(loss, ref, rtol=1e-4, atol=1e-4), (loss, ref)
    print("KERNEL_OK")
</pallas_src>

<mosaic_0001>
module attributes {stable_mosaic.version = 11 : i64} {
  func.func @_combo_kernel(%arg0: i32, %arg1: i32, %arg2: memref<1x4x256xf32, #tpu.memory_space<vmem>>, %arg3: memref<1x1x256xi32, #tpu.memory_space<vmem>>, %arg4: memref<1x1x1x128xf32, #tpu.memory_space<vmem>>, %arg5: memref<1x1x1x128xf32, #tpu.memory_space<vmem>>, %arg6: memref<1x1x1x128xf32, #tpu.memory_space<vmem>>) attributes {dimension_semantics = [#tpu.dimension_semantics<parallel>, #tpu.dimension_semantics<parallel>], iteration_bounds = array<i64: 2, 1>, scalar_prefetch = 0 : i64, scratch_operands = 0 : i64, tpu.core_type = #tpu.core_type<tc>, window_params = [{transform_indices = @transform_0, window_bounds = array<i64: 1, 4, 256>}, {transform_indices = @transform_1, window_bounds = array<i64: 1, 1, 256>}, {transform_indices = @transform_2, window_bounds = array<i64: 1, 1, 1, 128>}, {transform_indices = @transform_3, window_bounds = array<i64: 1, 1, 1, 128>}, {transform_indices = @transform_4, window_bounds = array<i64: 1, 1, 1, 128>}]} {
    %c0 = arith.constant 0 : index
    %c0_0 = arith.constant 0 : index
    %c0_1 = arith.constant 0 : index
    %0 = vector.load %arg2[%c0, %c0_0, %c0_1] : memref<1x4x256xf32, #tpu.memory_space<vmem>>, vector<1x4x256xf32>
    %1 = vector.shape_cast %0 : vector<1x4x256xf32> to vector<4x256xf32>
    %c0_2 = arith.constant 0 : index
    %c0_3 = arith.constant 0 : index
    %c0_4 = arith.constant 0 : index
    %2 = vector.load %arg3[%c0_2, %c0_3, %c0_4] : memref<1x1x256xi32, #tpu.memory_space<vmem>>, vector<1x1x256xi32>
    %3 = vector.shape_cast %2 : vector<1x1x256xi32> to vector<1x256xi32>
    %c1_i32 = arith.constant 1 : i32
    %4 = vector.broadcast %c1_i32 : i32 to vector<1x256xi32>
    %5 = arith.subi %3, %4 : vector<1x256xi32>
    %c-1_i32 = arith.constant -1 : i32
    %6 = vector.broadcast %c-1_i32 : i32 to vector<1x256xi32>
    %7 = arith.cmpi ne, %5, %6 : vector<1x256xi32>
    %8 = arith.extui %7 : vector<1x256xi1> to vector<1x256xi32>
    %9 = arith.sitofp %8 : vector<1x256xi32> to vector<1x256xf32>
    %c0_i32 = arith.constant 0 : i32
    %10 = vector.broadcast %c0_i32 : i32 to vector<1x256xi32>
    %11 = arith.select %7, %5, %10 : vector<1x256xi1>, vector<1x256xi32>
    %cst = arith.constant dense<0xFF800000> : vector<256xf32>
    %12 = vector.multi_reduction <maximumf>, %1, %cst [0] : vector<4x256xf32> to vector<256xf32>
    %13 = vector.shape_cast %12 : vector<256xf32> to vector<1x256xf32>
    %14 = vector.broadcast %13 : vector<1x256xf32> to vector<4x256xf32>
    %15 = arith.subf %1, %14 : vector<4x256xf32>
    %16 = math.exp %15 : vector<4x256xf32>
    %cst_5 = arith.constant dense<0.000000e+00> : vector<256xf32>
    %17 = vector.multi_reduction <add>, %16, %cst_5 [0] : vector<4x256xf32> to vector<256xf32>
    %18 = vector.shape_cast %17 : vector<256xf32> to vector<1x256xf32>
    %19 = tpu.reciprocal %18 : vector<1x256xf32> -> vector<1x256xf32>
    %20 = math.log %18 : vector<1x256xf32>
    %21 = tpu.iota {dimensions = array<i32: 0>} : vector<4x256xi32>
    %22 = vector.broadcast %11 : vector<1x256xi32> to vector<4x256xi32>
    %23 = arith.cmpi eq, %21, %22 : vector<4x256xi32>
    %cst_6 = arith.constant 0.000000e+00 : f32
    %24 = vector.broadcast %cst_6 : f32 to vector<4x256xf32>
    %25 = arith.select %23, %15, %24 : vector<4x256xi1>, vector<4x256xf32>
    %cst_7 = arith.constant dense<0.000000e+00> : vector<256xf32>
    %26 = vector.multi_reduction <add>, %25, %cst_7 [0] : vector<4x256xf32> to vector<256xf32>
    %27 = vector.shape_cast %26 : vector<256xf32> to vector<1x256xf32>
    %cst_8 = arith.constant 0.000000e+00 : f32
    %28 = vector.broadcast %cst_8 : f32 to vector<4x256xf32>
    %29 = arith.select %23, %16, %28 : vector<4x256xi1>, vector<4x256xf32>
    %cst_9 = arith.constant dense<0.000000e+00> : vector<256xf32>
    %30 = vector.multi_reduction <add>, %29, %cst_9 [0] : vector<4x256xf32> to vector<256xf32>
    %31 = vector.shape_cast %30 : vector<256xf32> to vector<1x256xf32>
    %32 = arith.subf %20, %27 : vector<1x256xf32>
    %33 = arith.mulf %32, %9 : vector<1x256xf32>
    %34 = arith.mulf %31, %19 : vector<1x256xf32>
    %35 = arith.mulf %34, %9 : vector<1x256xf32>
    %cst_10 = arith.constant dense<0.000000e+00> : vector<1xf32>
    %36 = vector.multi_reduction <add>, %33, %cst_10 [1] : vector<1x256xf32> to vector<1xf32>
    %37 = vector.shape_cast %36 : vector<1xf32> to vector<1x1xf32>
    %cst_11 = arith.constant dense<0.000000e+00> : vector<1xf32>
    %38 = vector.multi_reduction <add>, %35, %cst_11 [1] : vector<1x256xf32> to vector<1xf32>
    %39 = vector.shape_cast %38 : vector<1xf32> to vector<1x1xf32>
    %cst_12 = arith.constant dense<0.000000e+00> : vector<1xf32>
    %40 = vector.multi_reduction <add>, %9, %cst_12 [1] : vector<1x256xf32> to vector<1xf32>
    %41 = vector.shape_cast %40 : vector<1xf32> to vector<1x1xf32>
    %42 = vector.shape_cast %37 : vector<1x1xf32> to vector<1x1x1x1xf32>
    %43 = vector.shape_cast %42 : vector<1x1x1x1xf32> to vector<1x1x1x1xf32>
    %44 = vector.broadcast %43 : vector<1x1x1x1xf32> to vector<1x1x1x128xf32>
    %c0_13 = arith.constant 0 : index
    %c0_14 = arith.constant 0 : index
    %c0_15 = arith.constant 0 : index
    %c0_16 = arith.constant 0 : index
    %45 = vector.load %arg4[%c0_13, %c0_14, %c0_15, %c0_16] : memref<1x1x1x128xf32, #tpu.memory_space<vmem>>, vector<1x1x1x128xf32>
    tpu.vector_store %arg4[%c0_13, %c0_14, %c0_15, %c0_16], %44 {strides = array<i32>} : memref<1x1x1x128xf32, #tpu.memory_space<vmem>>, vector<1x1x1x128xf32>,
    %46 = vector.shape_cast %39 : vector<1x1xf32> to vector<1x1x1x1xf32>
    %47 = vector.shape_cast %46 : vector<1x1x1x1xf32> to vector<1x1x1x1xf32>
    %48 = vector.broadcast %47 : vector<1x1x1x1xf32> to vector<1x1x1x128xf32>
    %c0_17 = arith.constant 0 : index
    %c0_18 = arith.constant 0 : index
    %c0_19 = arith.constant 0 : index
    %c0_20 = arith.constant 0 : index
    %49 = vector.load %arg5[%c0_17, %c0_18, %c0_19, %c0_20] : memref<1x1x1x128xf32, #tpu.memory_space<vmem>>, vector<1x1x1x128xf32>
    tpu.vector_store %arg5[%c0_17, %c0_18, %c0_19, %c0_20], %48 {strides = array<i32>} : memref<1x1x1x128xf32, #tpu.memory_space<vmem>>, vector<1x1x1x128xf32>,
    %50 = vector.shape_cast %41 : vector<1x1xf32> to vector<1x1x1x1xf32>
    %51 = vector.shape_cast %50 : vector<1x1x1x1xf32> to vector<1x1x1x1xf32>
    %52 = vector.broadcast %51 : vector<1x1x1x1xf32> to vector<1x1x1x128xf32>
    %c0_21 = arith.constant 0 : index
    %c0_22 = arith.constant 0 : index
    %c0_23 = arith.constant 0 : index
    %c0_24 = arith.constant 0 : index
    %53 = vector.load %arg6[%c0_21, %c0_22, %c0_23, %c0_24] : memref<1x1x1x128xf32, #tpu.memory_space<vmem>>, vector<1x1x1x128xf32>
    tpu.vector_store %arg6[%c0_21, %c0_22, %c0_23, %c0_24], %52 {strides = array<i32>} : memref<1x1x1x128xf32, #tpu.memory_space<vmem>>, vector<1x1x1x128xf32>,
    return
  }
  func.func @transform_0(%arg0: i32, %arg1: i32) -> (i32, i32, i32) {
    %c0_i32 = arith.constant 0 : i32
    %c0_i32_0 = arith.constant 0 : i32
    return %arg0, %c0_i32, %arg1 : i32, i32, i32
  }
  func.func @transform_1(%arg0: i32, %arg1: i32) -> (i32, i32, i32) {
    %c0_i32 = arith.constant 0 : i32
    %c0_i32_0 = arith.constant 0 : i32
    return %arg0, %c0_i32, %arg1 : i32, i32, i32
  }
  func.func @transform_2(%arg0: i32, %arg1: i32) -> (i32, i32, i32, i32) {
    %c0_i32 = arith.constant 0 : i32
    %c0_i32_0 = arith.constant 0 : i32
    %c0_i32_1 = arith.constant 0 : i32
    return %arg0, %arg1, %c0_i32, %c0_i32_0 : i32, i32, i32, i32
  }
  func.func @transform_3(%arg0: i32, %arg1: i32) -> (i32, i32, i32, i32) {
    %c0_i32 = arith.constant 0 : i32
    %c0_i32_0 = arith.constant 0 : i32
    %c0_i32_1 = arith.constant 0 : i32
    return %arg0, %arg1, %c0_i32, %c0_i32_0 : i32, i32, i32, i32
  }
  func.func @transform_4(%arg0: i32, %arg1: i32) -> (i32, i32, i32, i32) {
    %c0_i32 = arith.constant 0 : i32
    %c0_i32_0 = arith.constant 0 : i32
    %c0_i32_1 = arith.constant 0 : i32
    return %arg0, %arg1, %c0_i32, %c0_i32_0 : i32, i32, i32, i32
  }
}

</mosaic_0001>

<bundles_post_ra>
// kernel: combo_loss.1
= control target key start
LH: loop header
LB: loop body
LE: loop exit
PB: predicated region body
PF: predicated region fallthrough
CT: control target
= control target key end

     0   :  { %s691_s15 = smov 0   ;;  %s693_s16 = smov 0   ;;  %s766_s0 = inlined_call_operand.vmem [shape: f32[2,4,256], index: 0, kind: input, shape index: {}]   ;;  %s767_s1 = inlined_call_operand.vmem [shape: s32[2,1,256], index: 1, kind: input, shape index: {}]   ;;  %s768_s2 = inlined_call_operand.vmem [shape: f32[2,1,1,128], index: 2, kind: output, shape index: {0}]   ;;  %s769_s3 = inlined_call_operand.vmem [shape: f32[2,1,1,128], index: 3, kind: output, shape index: {1}]   ;;  %s770_s4 = inlined_call_operand.vmem [shape: f32[2,1,1,128], index: 4, kind: output, shape index: {2}]  }
   0x1   :  { %s695_s17 = smov 0  }
   0x2 LB: > { %s27_s18 = sadd.s32 1, %s659_s16  ;;  %p596_p0 = scmp.ge.s32.totalorder %s663_s17, 1  ;;  %s663_s17 = sphi %s695_s17, %s15_s17   ;;  %s659_s16 = sphi %s693_s16, %s772_s16   ;;  %s655_s15 = sphi %s691_s15, %s771_s15  }
   0x3   : > { %p29_p1 = scmp.ge.s32.totalorder %s27_s18, 2  ;;  %p208_p2 = scmp.lt.s32.totalorder %s663_s17, 3 }
   0x5   : > { %s774_s18 = smov (%p29_p1, %s27_s18), 0  ;;  %p209_p3 = pnand %p596_p0, %p208_p2 }
   0x6   : > { %p260_p4 = scmp.lt.s32.totalorder (!%p209_p3), %s655_s15, 1  ;;  %v351_v0 = vlaneseq (!%p209_p3)  ;;  %vm306_vm0 = vcmask (!%p209_p3), 1043456   ;;  %v665_v11 = vmov (!%p209_p3), 0.0   ;;  %vm417_vm2 = vcmask (!%p209_p3), 1040384  }
   0x7   : > { %212 = sbr.rel (%p209_p3) target bundleno = 232 (0xe8), region = 28 }
   0x8   : > { %v352_v1 = vshrl.u32 (!%p209_p3), %v351_v0, 7 }
   0xa   : > { %v355_v9 = vsub.s32 (!%p209_p3), 0, %v352_v1  ;;  %v359_v10 = vsub.s32 (!%p209_p3), 1, %v352_v1 }
   0xe   : > { %s776_s15 = smov (!%p260_p4, %s655_s15), 1 }
   0xf   : > { %s604_s19 = sshll.u32 %s776_s15, 3  ;;  %s599_s20 = sshll.u32 %s776_s15, 1 }
  0x10   : > { %s267_s23 = scalar_lea.vmem %s766_s0, %s604_s19  ;;  %s276_s26 = scalar_lea.vmem %s767_s1, %s599_s20 }
  0x11   : > { %v296_v2 = vld [vmem:[%s267_s23] sm:$0xff]  ;;  %s295_s29 = scalar_lea.vmem %s770_s4, %s776_s15  ;;  %s283_s6 = scalar_lea.vmem %s768_s2, %s776_s15 }
  0x12   : > { %v297_v3 = vld [vmem:[%s276_s26] sm:$0x3]  ;;  %v304_v5 = vcombine.high %v296_v2, %v296_v2  ;;  %v307_v6 = vsel %vm306_vm0, %v296_v2, -inf  ;;  %s289_s9 = scalar_lea.vmem %s769_s3, %s776_s15 }
  0x13   : > { %v600_v4 = vadd.s32 4294967295, %v297_v3  ;;  %v308_v7 = vrot.slane %v307_v6, 4 }
  0x14   : > { %v314_v8 = vsel %vm306_vm0, %v304_v5, -inf }
  0x15   : > { %vm299_vm1 = vcmp.ne.s32.totalorder %v600_v4, 4294967295  ;;  %v309_v13 = vmax.f32 %v307_v6, %v308_v7  ;;  %v315_v14 = vrot.slane %v314_v8, 4 }
  0x16   : > { %v601_v12 = vsel %vm299_vm1, 1.0, %v665_v11  ;;  %v302_v31 = vsel %vm299_vm1, %v600_v4, 0 }
  0x17   : > { %v722_v15 = vrot.slane %v601_v12, %v355_v9  ;;  %v724_v16 = vrot.slane %v601_v12, %v359_v10  ;;  %v310_v17 = vrot.slane %v309_v13, 2  ;;  %v316_v18 = vmax.f32 %v314_v8, %v315_v14 }
  0x18   : > { %v356_v33 = vrot.slane %v302_v31, %v355_v9  ;;  %v360_v34 = vrot.slane %v302_v31, %v359_v10 }
  0x19   : > { %v428_v19 = vsel %vm417_vm2, %v722_v15, 0.0  ;;  %v429_v20 = vsel %vm417_vm2, %v724_v16, 0.0  ;;  %v311_v21 = vmax.f32 %v309_v13, %v310_v17  ;;  %v317_v22 = vrot.slane %v316_v18, 2 }
  0x1a   : > { %v430_v23 = vadd.f32 %v429_v20, %v428_v19  ;;  %vm361_vm3 = vcmp.eq.s32.totalorder %v352_v1, %v356_v33  ;;  %vm362_vm4 = vcmp.eq.s32.totalorder %v352_v1, %v360_v34 }
  0x1b   : > { %v312_v24 = vrot.slane %v311_v21, 1  ;;  %v318_v25 = vmax.f32 %v316_v18, %v317_v22 }
  0x1c   : > { %431 = vadd.xlane.f32.xlu1 %v430_v23 }
  0x1d   : > { %v313_v26 = vmax.f32 %v311_v21, %v312_v24  ;;  %v319_v27 = vrot.slane %v318_v25, 1 }
  0x1f   : > { %v320_v28 = vmax.f32 %v318_v25, %v319_v27 }
  0x21   : > { %v323_v29 = vcombine.low %v313_v26, %v320_v28 }
  0x23   : > { %v325_v30 = vsub.f32 %v296_v2, %v323_v29 }
  0x25   : > { %v326_v32 = vmul.f32 1.442695, %v325_v30  ;;  %v364_v35 = vcombine.high %v325_v30, %v325_v30  ;;  %v366_v36 = vsel %vm361_vm3, %v325_v30, 0.0 }
  0x26   : > { %v368_v41 = vsel %vm306_vm0, %v366_v36, 0.0 }
  0x27   : > { %631 = vpow2.f32 %v326_v32  ;;  %v367_v37 = vsel %vm362_vm4, %v364_v35, 0.0  ;;  %v369_v51 = vrot.slane %v368_v41, 4 }
  0x28   : > { %v375_v44 = vsel %vm306_vm0, %v367_v37, 0.0 }
  0x29   : > { %v376_v53 = vrot.slane %v375_v44, 4  ;;  %v370_v60 = vadd.f32 %v369_v51, %v368_v41 }
  0x2b   : > { %v377_v62 = vadd.f32 %v376_v53, %v375_v44  ;;  %v371_v4 = vrot.slane %v370_v60, 2 }
  0x2d   : > { %v378_v6 = vrot.slane %v377_v62, 2  ;;  %v372_v9 = vadd.f32 %v371_v4, %v370_v60 }
  0x2f   : > { %v379_v11 = vadd.f32 %v378_v6, %v377_v62  ;;  %v373_v13 = vrot.slane %v372_v9, 1 }
  0x31   : > { %v632_v38 = vpop.eup %631  ;;  %v380_v17 = vrot.slane %v379_v11, 1  ;;  %v374_v20 = vadd.f32 %v373_v13, %v372_v9 }
  0x32   : > { %v329_v39 = vcombine.high %v632_v38, %v632_v38  ;;  %v331_v40 = vsel %vm306_vm0, %v632_v38, 0.0  ;;  %v382_v42 = vsel %vm361_vm3, %v632_v38, 0.0 }
  0x33   : > { %v332_v43 = vrot.slane %v331_v40, 4  ;;  %v384_v45 = vsel %vm306_vm0, %v382_v42, 0.0  ;;  %v381_v23 = vadd.f32 %v380_v17, %v379_v11 }
  0x34   : > { %v338_v46 = vsel %vm306_vm0, %v329_v39, 0.0  ;;  %v383_v47 = vsel %vm362_vm4, %v329_v39, 0.0  ;;  %v385_v48 = vrot.slane %v384_v45, 4 }
  0x35   : > { %v333_v49 = vadd.f32 %v332_v43, %v331_v40  ;;  %v339_v50 = vrot.slane %v338_v46, 4  ;;  %v391_v52 = vsel %vm306_vm0, %v383_v47, 0.0 }
  0x36   : > { %v386_v54 = vadd.f32 %v385_v48, %v384_v45  ;;  %v392_v55 = vrot.slane %v391_v52, 4 }
  0x37   : > { %v334_v56 = vrot.slane %v333_v49, 2  ;;  %v340_v57 = vadd.f32 %v339_v50, %v338_v46 }
  0x38   : > { %v393_v61 = vadd.f32 %v392_v55, %v391_v52  ;;  %v387_v63 = vrot.slane %v386_v54, 2 }
  0x39   : > { %v335_v58 = vadd.f32 %v334_v56, %v333_v49  ;;  %v341_v59 = vrot.slane %v340_v57, 2 }
  0x3a   : > { %v394_v5 = vrot.slane %v393_v61, 2  ;;  %v388_v7 = vadd.f32 %v387_v63, %v386_v54 }
  0x3b   : > { %v336_v0 = vrot.slane %v335_v58, 1  ;;  %v342_v1 = vadd.f32 %v341_v59, %v340_v57 }
  0x3c   : > { %v395_v10 = vadd.f32 %v394_v5, %v393_v61  ;;  %v389_v12 = vrot.slane %v388_v7, 1 }
  0x3d   : > { %v337_v2 = vadd.f32 %v336_v0, %v335_v58  ;;  %v343_v3 = vrot.slane %v342_v1, 1 }
  0x3e   : > { %v396_v14 = vrot.slane %v395_v10, 1  ;;  %v390_v18 = vadd.f32 %v389_v12, %v388_v7 }
  0x3f   : > { %v344_v8 = vadd.f32 %v343_v3, %v342_v1  ;;  %633 = vrcp.f32 %v337_v2 }
  0x40   : > { %635 = vlog2.f32 %v337_v2  ;;  %v397_v21 = vadd.f32 %v396_v14, %v395_v10 }
  0x41   : > { %637 = vlog2.f32 %v344_v8 }
  0x42   : > { %639 = vrcp.f32 %v344_v8 }
  0x49   : > { %v634_v19 = vpop.eup %633 }
  0x4a   : > { %v636_v22 = vpop.eup %635  ;;  %v413_v24 = vmul.f32 %v634_v19, %v390_v18 }
  0x4b   : > { %v638_v25 = vpop.eup %637  ;;  %v348_v26 = vmul.f32 0.6931472, %v636_v22 }
  0x4c   : > { %v640_v27 = vpop.eup %639  ;;  %v350_v28 = vmul.f32 0.6931472, %v638_v25  ;;  %v415_v32 = vmul.f32 %v413_v24, %v722_v15 }
  0x4d   : > { %v398_v29 = vsub.f32 %v348_v26, %v374_v20  ;;  %v414_v30 = vmul.f32 %v640_v27, %v397_v21 }
  0x4e   : > { %v399_v31 = vsub.f32 %v350_v28, %v381_v23  ;;  %v423_v38 = vsel %vm417_vm2, %v415_v32, 0.0 }
  0x4f   : > { %v411_v33 = vmul.f32 %v722_v15, %v398_v29  ;;  %v416_v34 = vmul.f32 %v414_v30, %v724_v16 }
  0x50   : > { %v412_v35 = vmul.f32 %v724_v16, %v399_v31 }
  0x51   : > { %v418_v36 = vsel %vm417_vm2, %v411_v33, 0.0  ;;  %v424_v39 = vsel %vm417_vm2, %v416_v34, 0.0 }
  0x52   : > { %v419_v37 = vsel %vm417_vm2, %v412_v35, 0.0  ;;  %v425_v41 = vadd.f32 %v424_v39, %v423_v38 }
  0x53   : > { %v420_v40 = vadd.f32 %v419_v37, %v418_v36 }
  0x55   : > { %421 = vadd.xlane.f32.xlu0 %v420_v40 }
  0x59   : > { %426 = vadd.xlane.f32.xlu0 %v425_v41 }
  0xa9   : > { %v432_v15 = vpop.xlane.xlu1 %431 }
  0xaa   : > { %435 = vst [vmem:[%s295_s29] sm:$0x1] %v432_v15 }
  0xe2   : > { %v422_v16 = vpop.xlane.xlu0 %421 }
  0xe3   : > { %433 = vst [vmem:[%s283_s6] sm:$0x1] %v422_v16 }
  0xe6   : > { %v427_v42 = vpop.xlane.xlu0 %426 }
  0xe7   : > { %434 = vst [vmem:[%s289_s9] sm:$0x1] %v427_v42 }
  0xe8 PF: > { %s15_s17 = sadd.s32 1, %s663_s17   ;;  %s771_s15 = smov %s659_s16 }
  0xe9   : > { %p12_p5 = scmp.ge.s32.totalorder %s15_s17, 4   ;;  %s772_s16 = smov %s774_s18 }
  0xeb   :  { %14 = sbr.rel (!%p12_p5) target bundleno = 2 (0x2), region = 85 }

</bundles_post_ra>
